<compile_context>
chip_gen: v5e
topology: v5e:2x2
jax: 0.10.0
libtpu: 0.0.40
codegen_flags: <defaults>
</compile_context>

<pallas_src>
import functools
import math

import jax
import jax.numpy as jnp
from jax import lax
from jax.experimental import pallas as pl
from jax.experimental.pallas import tpu as pltpu


def _round_up(n: int, m: int) -> int:
    return ((n + m - 1) // m) * m


# ----------------------------------------------------------------------------
# Path 1: LUT resident in VMEM, gather via in-VMEM dynamic row loads.
# ----------------------------------------------------------------------------
def _resident_gather_kernel(ids_ref, lut_ref, out_ref, *,
                            tokens_per_block, scale):
    """ids_ref: SMEM (n_padded,) int32 (scalar prefetch)
       lut_ref: VMEM (vocab, d_model)  -- same block every step => resident
       out_ref: VMEM (tokens_per_block, d_model)"""
    i = pl.program_id(0)
    base = pl.multiple_of(i * tokens_per_block, tokens_per_block)

    def _gather(t, carry):
        tok = ids_ref[base + t]
        out_ref[pl.ds(t, 1), :] = lut_ref[pl.ds(tok, 1), :]
        return carry

    # Unrolled so the scalar id load / address compute / vld chain pipelines.
    lax.fori_loop(0, tokens_per_block, _gather, 0, unroll=8)

    # Single block-wide VPU scale + lane-dense store.
    out_ref[...] = (out_ref[...].astype(jnp.float32) * scale).astype(out_ref.dtype)


# ----------------------------------------------------------------------------
# Path 2: LUT stays in HBM, gather via per-row async copies (large tables).
# ----------------------------------------------------------------------------
def _hbm_gather_kernel(ids_ref, lut_hbm, out_ref, gbuf, sem, *,
                       tokens_per_block, scale):
    """ids_ref: SMEM (n_padded,) int32 (scalar prefetch)
       lut_hbm: HBM (vocab, d_model) (memory_space=pl.ANY)
       out_ref: VMEM (tokens_per_block, d_model)
       gbuf   : VMEM (tokens_per_block, d_model) gather landing buffer
       sem    : DMA semaphore shared by all row copies of this block"""
    i = pl.program_id(0)
    base = pl.multiple_of(i * tokens_per_block, tokens_per_block)

    def _start(t, carry):
        tok = ids_ref[base + t]
        pltpu.make_async_copy(
            lut_hbm.at[pl.ds(tok, 1), :],
            gbuf.at[pl.ds(t, 1), :],
            sem,
        ).start()
        return carry

    # Issue all row gathers; unrolled for descriptor-issue pipelining.
    lax.fori_loop(0, tokens_per_block, _start, 0, unroll=8)

    def _wait(t, carry):
        pltpu.make_async_copy(
            lut_hbm.at[pl.ds(0, 1), :],   # source index irrelevant for wait
            gbuf.at[pl.ds(t, 1), :],
            sem,
        ).wait()
        return carry

    # Per-row waits (byte counts match each issued copy exactly), unrolled.
    lax.fori_loop(0, tokens_per_block, _wait, 0, unroll=8)

    out_ref[...] = (gbuf[...].astype(jnp.float32) * scale).astype(out_ref.dtype)


# ----------------------------------------------------------------------------
# Wrapper
# ----------------------------------------------------------------------------
def embeddings_forward(lut, x, *, tokens_per_block=256,
                       max_resident_lut_bytes=24 * 1024 * 1024):
    """lut: (vocab, d_model); x: (...,) int ids -> (..., d_model) in lut.dtype."""
    vocab, d_model = lut.shape
    id_shape = x.shape
    n_tokens = max(1, math.prod(id_shape))
    itemsize = jnp.dtype(lut.dtype).itemsize

    # ---- token-block sizing -------------------------------------------------
    n8 = _round_up(n_tokens, 8)
    tpb = min(max(8, _round_up(tokens_per_block, 8)), n8)
    # Short inputs: split into >=2 blocks so the "parallel" grid axis can use
    # both TensorCores on megacore parts (v7x).
    if n8 >= 16 and n8 <= 2 * tpb:
        tpb = _round_up((n8 + 1) // 2, 8)
    # Prefer a block size that divides the (8-padded) token count: no padding,
    # and the post-call [:n_tokens] slice copy is skipped.
    if n8 % tpb:
        for cand in range(tpb - 8, max(8, tpb // 2) - 1, -8):
            if n8 % cand == 0:
                tpb = cand
                break

    lut_bytes = vocab * d_model * itemsize
    resident = lut_bytes <= max_resident_lut_bytes
    vmem_budget = 56 * 1024 * 1024          # conservative for v7x (64 MiB phys)
    if resident:
        # Shrink the token block if (double-buffered) LUT + output would not
        # fit the conservative budget (only matters for very large d_model).
        def _need(t):
            return 2 * lut_bytes + 2 * t * d_model * itemsize + (4 << 20)
        while tpb > 8 and _need(tpb) > vmem_budget:
            tpb = max(8, _round_up(tpb // 2, 8))
        if _need(tpb) > vmem_budget:
            resident = False

    n_padded = _round_up(n_tokens, tpb)
    out_blk_bytes = tpb * d_model * itemsize

    # ---- ids: flatten, clamp (guards gathers), pad only if needed ----------
    ids = jnp.clip(x.reshape(n_tokens).astype(jnp.int32), 0, vocab - 1)
    if n_padded != n_tokens:
        ids = jnp.pad(ids, (0, n_padded - n_tokens))

    scale = float(math.sqrt(d_model))
    grid = (n_padded // tpb,)

    if resident:
        kernel = functools.partial(
            _resident_gather_kernel, tokens_per_block=tpb, scale=scale)
        in_specs = [
            # Constant block index => fetched once, stays VMEM-resident.
            pl.BlockSpec((vocab, d_model), lambda i, ids_ref: (0, 0)),
        ]
        scratch_shapes = []
        vmem_need = 2 * lut_bytes + 2 * out_blk_bytes + (4 << 20)
    else:
        kernel = functools.partial(
            _hbm_gather_kernel, tokens_per_block=tpb, scale=scale)
        in_specs = [
            # Full LUT stays in HBM; rows gathered manually via DMA.
            pl.BlockSpec(memory_space=pl.ANY),
        ]
        scratch_shapes = [
            pltpu.VMEM((tpb, d_model), lut.dtype),   # gather buffer
            pltpu.SemaphoreType.DMA,                 # row-copy semaphore
        ]
        vmem_need = 3 * out_blk_bytes + (4 << 20)

    out_flat = pl.pallas_call(
        kernel,
        out_shape=jax.ShapeDtypeStruct((n_padded, d_model), lut.dtype),
        grid_spec=pltpu.PrefetchScalarGridSpec(
            num_scalar_prefetch=1,                   # ids -> SMEM
            grid=grid,
            in_specs=in_specs,
            out_specs=pl.BlockSpec((tpb, d_model), lambda i, ids_ref: (i, 0)),
            scratch_shapes=scratch_shapes,
        ),
        compiler_params=pltpu.CompilerParams(
            dimension_semantics=("parallel",),       # token blocks independent
            vmem_limit_bytes=int(max(vmem_need, 32 * 1024 * 1024)),
        ),
    )(ids, lut)

    if n_padded != n_tokens:
        out_flat = out_flat[:n_tokens]
    return out_flat.reshape(*id_shape, d_model)


if __name__ == "__main__":
    key = jax.random.PRNGKey(0)
    k_lut, k_ids, k_ids2 = jax.random.split(key, 3)

    # Small shapes; d_model = 128 keeps the output tile lane-dense.
    vocab, d_model = 32, 128
    batch, seq = 2, 8

    # nn.Embedding default init: weight ~ N(0, 1)
    lut = jax.random.normal(k_lut, (vocab, d_model), dtype=jnp.float32)
    x = jax.random.randint(k_ids, (batch, seq), 0, vocab, dtype=jnp.int32)
    ref = lut[x] * math.sqrt(d_model)

    # 1) Default dispatch -> VMEM-resident fast path (2 token blocks).
    out = jax.block_until_ready(embeddings_forward(lut, x))
    assert out.shape == (batch, seq, d_model)
    assert jnp.allclose(out, ref, atol=1e-5, rtol=1e-5)

    # 2) Padded / partial-final-block path (15 tokens -> padded to 16).
    x2 = jax.random.randint(k_ids2, (3, 5), 0, vocab, dtype=jnp.int32)
    out2 = jax.block_until_ready(embeddings_forward(lut, x2))
    ref2 = lut[x2] * math.sqrt(d_model)
    assert out2.shape == (3, 5, d_model)
    assert jnp.allclose(out2, ref2, atol=1e-5, rtol=1e-5)

    # 3) Force the large-table HBM-gather fallback path and check it too.
    out3 = jax.block_until_ready(
        embeddings_forward(lut, x, max_resident_lut_bytes=0))
    assert jnp.allclose(out3, ref, atol=1e-5, rtol=1e-5)

    print("KERNEL_OK")
</pallas_src>

<mosaic_0001>
module attributes {stable_mosaic.version = 11 : i64} {
  func.func @_resident_gather_kernel(%arg0: i32, %arg1: memref<16xi32, #tpu.memory_space<smem>>, %arg2: memref<32x128xf32, #tpu.memory_space<vmem>>, %arg3: memref<8x128xf32, #tpu.memory_space<vmem>>) attributes {dimension_semantics = [#tpu.dimension_semantics<parallel>], iteration_bounds = array<i64: 2>, scalar_prefetch = 1 : i64, scratch_operands = 0 : i64, tpu.core_type = #tpu.core_type<tc>, window_params = [{pipeline_mode = #tpu.pipeline_mode<synchronous>, transform_indices = @transform_0, window_bounds = array<i64: 32, 128>}, {transform_indices = @transform_1, window_bounds = array<i64: 8, 128>}]} {
    %c8_i32 = arith.constant 8 : i32
    %0 = arith.muli %arg0, %c8_i32 : i32
    %1 = tpu.assume_multiple %0, 8 : i32
    %c0_i32 = arith.constant 0 : i32
    %2 = arith.addi %1, %c0_i32 : i32
    %3 = arith.index_cast %2 : i32 to index
    %4 = memref.load %arg1[%3] : memref<16xi32, #tpu.memory_space<smem>>
    %5 = arith.index_cast %4 : i32 to index
    %c0 = arith.constant 0 : index
    %6 = vector.load %arg2[%5, %c0] : memref<32x128xf32, #tpu.memory_space<vmem>>, vector<1x128xf32>
    %7 = arith.index_cast %c0_i32 : i32 to index
    %c0_0 = arith.constant 0 : index
    %8 = vector.load %arg3[%7, %c0_0] : memref<8x128xf32, #tpu.memory_space<vmem>>, vector<1x128xf32>
    tpu.vector_store %arg3[%7, %c0_0], %6 {strides = array<i32>} : memref<8x128xf32, #tpu.memory_space<vmem>>, vector<1x128xf32>,
    %c1_i32 = arith.constant 1 : i32
    %9 = arith.addi %1, %c1_i32 : i32
    %10 = arith.index_cast %9 : i32 to index
    %11 = memref.load %arg1[%10] : memref<16xi32, #tpu.memory_space<smem>>
    %12 = arith.index_cast %11 : i32 to index
    %c0_1 = arith.constant 0 : index
    %13 = vector.load %arg2[%12, %c0_1] : memref<32x128xf32, #tpu.memory_space<vmem>>, vector<1x128xf32>
    %14 = arith.index_cast %c1_i32 : i32 to index
    %c0_2 = arith.constant 0 : index
    %15 = vector.load %arg3[%14, %c0_2] : memref<8x128xf32, #tpu.memory_space<vmem>>, vector<1x128xf32>
    tpu.vector_store %arg3[%14, %c0_2], %13 {strides = array<i32>} : memref<8x128xf32, #tpu.memory_space<vmem>>, vector<1x128xf32>,
    %c2_i32 = arith.constant 2 : i32
    %16 = arith.addi %1, %c2_i32 : i32
    %17 = arith.index_cast %16 : i32 to index
    %18 = memref.load %arg1[%17] : memref<16xi32, #tpu.memory_space<smem>>
    %19 = arith.index_cast %18 : i32 to index
    %c0_3 = arith.constant 0 : index
    %20 = vector.load %arg2[%19, %c0_3] : memref<32x128xf32, #tpu.memory_space<vmem>>, vector<1x128xf32>
    %21 = arith.index_cast %c2_i32 : i32 to index
    %c0_4 = arith.constant 0 : index
    %22 = vector.load %arg3[%21, %c0_4] : memref<8x128xf32, #tpu.memory_space<vmem>>, vector<1x128xf32>
    tpu.vector_store %arg3[%21, %c0_4], %20 {strides = array<i32>} : memref<8x128xf32, #tpu.memory_space<vmem>>, vector<1x128xf32>,
    %c3_i32 = arith.constant 3 : i32
    %23 = arith.addi %1, %c3_i32 : i32
    %24 = arith.index_cast %23 : i32 to index
    %25 = memref.load %arg1[%24] : memref<16xi32, #tpu.memory_space<smem>>
    %26 = arith.index_cast %25 : i32 to index
    %c0_5 = arith.constant 0 : index
    %27 = vector.load %arg2[%26, %c0_5] : memref<32x128xf32, #tpu.memory_space<vmem>>, vector<1x128xf32>
    %28 = arith.index_cast %c3_i32 : i32 to index
    %c0_6 = arith.constant 0 : index
    %29 = vector.load %arg3[%28, %c0_6] : memref<8x128xf32, #tpu.memory_space<vmem>>, vector<1x128xf32>
    tpu.vector_store %arg3[%28, %c0_6], %27 {strides = array<i32>} : memref<8x128xf32, #tpu.memory_space<vmem>>, vector<1x128xf32>,
    %c4_i32 = arith.constant 4 : i32
    %30 = arith.addi %1, %c4_i32 : i32
    %31 = arith.index_cast %30 : i32 to index
    %32 = memref.load %arg1[%31] : memref<16xi32, #tpu.memory_space<smem>>
    %33 = arith.index_cast %32 : i32 to index
    %c0_7 = arith.constant 0 : index
    %34 = vector.load %arg2[%33, %c0_7] : memref<32x128xf32, #tpu.memory_space<vmem>>, vector<1x128xf32>
    %35 = arith.index_cast %c4_i32 : i32 to index
    %c0_8 = arith.constant 0 : index
    %36 = vector.load %arg3[%35, %c0_8] : memref<8x128xf32, #tpu.memory_space<vmem>>, vector<1x128xf32>
    tpu.vector_store %arg3[%35, %c0_8], %34 {strides = array<i32>} : memref<8x128xf32, #tpu.memory_space<vmem>>, vector<1x128xf32>,
    %c5_i32 = arith.constant 5 : i32
    %37 = arith.addi %1, %c5_i32 : i32
    %38 = arith.index_cast %37 : i32 to index
    %39 = memref.load %arg1[%38] : memref<16xi32, #tpu.memory_space<smem>>
    %40 = arith.index_cast %39 : i32 to index
    %c0_9 = arith.constant 0 : index
    %41 = vector.load %arg2[%40, %c0_9] : memref<32x128xf32, #tpu.memory_space<vmem>>, vector<1x128xf32>
    %42 = arith.index_cast %c5_i32 : i32 to index
    %c0_10 = arith.constant 0 : index
    %43 = vector.load %arg3[%42, %c0_10] : memref<8x128xf32, #tpu.memory_space<vmem>>, vector<1x128xf32>
    tpu.vector_store %arg3[%42, %c0_10], %41 {strides = array<i32>} : memref<8x128xf32, #tpu.memory_space<vmem>>, vector<1x128xf32>,
    %c6_i32 = arith.constant 6 : i32
    %44 = arith.addi %1, %c6_i32 : i32
    %45 = arith.index_cast %44 : i32 to index
    %46 = memref.load %arg1[%45] : memref<16xi32, #tpu.memory_space<smem>>
    %47 = arith.index_cast %46 : i32 to index
    %c0_11 = arith.constant 0 : index
    %48 = vector.load %arg2[%47, %c0_11] : memref<32x128xf32, #tpu.memory_space<vmem>>, vector<1x128xf32>
    %49 = arith.index_cast %c6_i32 : i32 to index
    %c0_12 = arith.constant 0 : index
    %50 = vector.load %arg3[%49, %c0_12] : memref<8x128xf32, #tpu.memory_space<vmem>>, vector<1x128xf32>
    tpu.vector_store %arg3[%49, %c0_12], %48 {strides = array<i32>} : memref<8x128xf32, #tpu.memory_space<vmem>>, vector<1x128xf32>,
    %c7_i32 = arith.constant 7 : i32
    %51 = arith.addi %1, %c7_i32 : i32
    %52 = arith.index_cast %51 : i32 to index
    %53 = memref.load %arg1[%52] : memref<16xi32, #tpu.memory_space<smem>>
    %54 = arith.index_cast %53 : i32 to index
    %c0_13 = arith.constant 0 : index
    %55 = vector.load %arg2[%54, %c0_13] : memref<32x128xf32, #tpu.memory_space<vmem>>, vector<1x128xf32>
    %56 = arith.index_cast %c7_i32 : i32 to index
    %c0_14 = arith.constant 0 : index
    %57 = vector.load %arg3[%56, %c0_14] : memref<8x128xf32, #tpu.memory_space<vmem>>, vector<1x128xf32>
    tpu.vector_store %arg3[%56, %c0_14], %55 {strides = array<i32>} : memref<8x128xf32, #tpu.memory_space<vmem>>, vector<1x128xf32>,
    %c8_i32_15 = arith.constant 8 : i32
    %c0_16 = arith.constant 0 : index
    %c0_17 = arith.constant 0 : index
    %58 = vector.load %arg3[%c0_16, %c0_17] : memref<8x128xf32, #tpu.memory_space<vmem>>, vector<8x128xf32>
    %cst = arith.constant 11.3137083 : f32
    %59 = vector.broadcast %cst : f32 to vector<8x128xf32>
    %60 = arith.mulf %58, %59 : vector<8x128xf32>
    %c0_18 = arith.constant 0 : index
    %c0_19 = arith.constant 0 : index
    %61 = vector.load %arg3[%c0_18, %c0_19] : memref<8x128xf32, #tpu.memory_space<vmem>>, vector<8x128xf32>
    tpu.vector_store %arg3[%c0_18, %c0_19], %60 {strides = array<i32>} : memref<8x128xf32, #tpu.memory_space<vmem>>, vector<8x128xf32>,
    return
  }
  func.func @transform_0(%arg0: i32, %arg1: memref<16xi32, #tpu.memory_space<smem>>) -> (i32, i32) {
    %c0_i32 = arith.constant 0 : i32
    %c0_i32_0 = arith.constant 0 : i32
    %c0_i32_1 = arith.constant 0 : i32
    return %c0_i32, %c0_i32_0 : i32, i32
  }
  func.func @transform_1(%arg0: i32, %arg1: memref<16xi32, #tpu.memory_space<smem>>) -> (i32, i32) {
    %c0_i32 = arith.constant 0 : i32
    %c0_i32_0 = arith.constant 0 : i32
    return %arg0, %c0_i32 : i32, i32
  }
}

</mosaic_0001>

<bundles_post_ra>
// kernel: tpu_custom_call.1
= control target key start
LH: loop header
LB: loop body
LE: loop exit
PB: predicated region body
PF: predicated region fallthrough
CT: control target
= control target key end

     0   :  { %s423_s12 = smov [#allocation3]   ;;  %s563_s0 = inlined_call_operand.hbm [shape: s32[16], index: 0, kind: input, shape index: {}]   ;;  %s564_s1 = inlined_call_operand.hbm [shape: f32[32,128], index: 1, kind: input, shape index: {}]   ;;  %s565_s2 = inlined_call_operand.hbm [shape: f32[16,128], index: 2, kind: output, shape index: {}]  }
   0x1   :  { %s8_s11 = sshll.u32 %s563_s0, 4  ;;  %s9_s11 = int_to_ptr.hbm [resolvable:$true] %s8_s11 }
   0x2   :  { %11 = dma.hbm_to_smem %s9_s11, 16, %s423_s12, [#allocation2] }
   0x3   :  { %397 = dma.done.wait [#allocation2], 16 }
   0x4   :  { %398 = vsyncadd [#allocation2], 4294967280 }
   0x5   :  { %14 = sfence }
   0x6   :  { %15 = vsyncpa [#allocation5], 0 }
   0x7   :  { %16 = vsyncpa [#allocation6], 0 }
   0x8   :  { %18 = vsyncpa [#allocation6 + $0x1], 0  ;;  %s445_s13 = smov 0   ;;  %s447_s14 = smov 0  }
   0x9   :  { %s449_s15 = smov 0   ;;  %s451_s16 = smov 0  }
   0xa LB: > { %s466_s0 = sadd.s32 4294967295, %s421_s16   ;;  %s247_s17 = sadd.s32 4294967294, %s421_s16   ;;  %s421_s16 = sphi %s451_s16, %s571_s16   ;;  %s417_s15 = sphi %s449_s15, %s570_s15   ;;  %s413_s14 = sphi %s447_s14, %s569_s14   ;;  %s409_s13 = sphi %s445_s13, %s568_s13  }
   0xb   : > { %s470_s18 = sadd.s32 1, %s421_s16   ;;  %s52_s19 = sadd.s32 1, %s417_s15 }
   0xc   : > { %s49_s20 = ssub.s32 %s421_s16, %s470_s18  ;;  %p62_p0 = scmp.ne.s32.totalorder %s417_s15, %s413_s14 }
   0xd   : > { %p50_p1 = scmp.eq.s32.totalorder %s49_s20, 0  ;;  %p63_p2 = scmp.eq.s32.totalorder %s466_s0, 1 }
   0xe   : > { %p68_p3 = scmp.ne.s32.totalorder %s413_s14, %s409_s13  ;;  %p69_p4 = scmp.eq.s32.totalorder %s247_s17, 1 }
   0xf   : > { %s481_s21 = scalar_select %p50_p1, %s417_s15, %s52_s19  }
  0x10   : > { %p483_p5 = por %p63_p2, %p62_p0  ;;  %p487_p6 = por %p69_p4, %p68_p3 }
  0x11   : > { %p248_p7 = scmp.ge.s32.totalorder %s421_s16, 1  ;;  %p76_p8 = scmp.lt.s32.totalorder %s421_s16, 3 }
  0x12   : > { %p272_p9 = scmp.eq.s32.totalorder %s466_s0, 0  ;;  %s87_s26 = sshll.u32 %s564_s1, 4  ;;  %s88_s26 = int_to_ptr.hbm [resolvable:$true] %s87_s26 }
  0x13   : > { %p77_p10 = pnand %p248_p7, %p76_p8  ;;  %s424_s27 = smov [#allocation4]  }
  0x14   : > { %s89_s28 = sshll.u32 %s424_s27, 4  ;;  %s425_s29 = smov 128   ;;  %s90_s28 = int_to_ptr.vmem [resolvable:$true] %s89_s28 }
  0x15   : > { %p264_p11 = pneg %p77_p10  ;;  %s426_s30 = smov 8  }
  0x16   : > { %105 = sbr.rel (%p77_p10) target bundleno = 59 (0x3b), region = 24 }
  0x17   : > { %p265_p12 = pnand %p272_p9, %p264_p11 }
  0x19   : > { %267 = dma.hbm_to_vmem [thread:$0]  (!%p265_p12), %s88_s26, 512, %s90_s28, [#allocation5], %s425_s29, %s425_s29, %s426_s30  }
  0x1b   : > { %400 = dma.done.wait (%p272_p9), [#allocation5], 512  }
  0x1c   : > { %402 = vsyncadd (%p272_p9), [#allocation5], 4294966784  ;;  %s118_s3 = sand.u32 1, %s413_s14   ;;  %s505_s4 = sshll.u32 %s466_s0, 3 }
  0x1d   : > { %s252_s5 = sshll.u32 %s118_s3, 3  ;;  %s122_s6 = sld [smem:[#allocation3 + %s505_s4]] }
  0x1e   : > { %s126_s7 = sadd.s32 1, %s505_s4  ;;  %s131_s9 = sadd.s32 2, %s505_s4 }
  0x1f   : > { %s127_s8 = sld [smem:[#allocation3 + %s126_s7]]  ;;  %s136_s11 = sadd.s32 3, %s505_s4 }
  0x20   : > { %s132_s10 = sld [smem:[#allocation3 + %s131_s9]]  ;;  %s141_s17 = sadd.s32 4, %s505_s4 }
  0x21   : > { %s137_s12 = sld [smem:[#allocation3 + %s136_s11]]  ;;  %s146_s19 = sadd.s32 5, %s505_s4 }
  0x22   : > { %s142_s0 = sld [smem:[#allocation3 + %s141_s17]]  ;;  %s151_s25 = sadd.s32 6, %s505_s4 }
  0x23   : > { %s147_s20 = sld [smem:[#allocation3 + %s146_s19]]  ;;  %s123_s24 = scalar_lea.vmem [#allocation4], %s122_s6 }
  0x24   : > { %v124_v0 = vld [vmem:[%s123_s24] sm:$0x1]  ;;  %s156_s26 = sadd.s32 7, %s505_s4  ;;  %s517_s27 = scalar_lea.vmem [#allocation7], %s252_s5 }
  0x25   : > { %125 = vst [vmem:[%s517_s27] sm:$0x1] %v124_v0  ;;  %s152_s28 = sld [smem:[#allocation3 + %s151_s25]]  ;;  %s128_s29 = scalar_lea.vmem [#allocation4], %s127_s8 }
  0x26   : > { %v129_v1 = vld [vmem:[%s128_s29] sm:$0x1]  ;;  %s157_s30 = sld [smem:[#allocation3 + %s156_s26]]  ;;  %s133_s7 = scalar_lea.vmem [#allocation4], %s132_s10 }
  0x27   : > { %130 = vst [vmem:[%s517_s27 + $0x1] sm:$0x1] %v129_v1  ;;  %v134_v2 = vld [vmem:[%s133_s7] sm:$0x1]  ;;  %s138_s5 = scalar_lea.vmem [#allocation4], %s137_s12  ;;  %s175_s17 = scalar_lea.hbm %s565_s2, %s505_s4 }
  0x28   : > { %135 = vst [vmem:[%s517_s27 + $0x2] sm:$0x1] %v134_v2  ;;  %v139_v3 = vld [vmem:[%s138_s5] sm:$0x1]  ;;  %s143_s6 = scalar_lea.vmem [#allocation4], %s142_s0  ;;  %s177_s19 = sshll.u32 %s517_s27, 4  ;;  %s178_s19 = int_to_ptr.vmem [resolvable:$true] %s177_s19 }
  0x29   : > { %140 = vst [vmem:[%s517_s27 + $0x3] sm:$0x1] %v139_v3  ;;  %v144_v4 = vld [vmem:[%s143_s6] sm:$0x1]  ;;  %s148_s9 = scalar_lea.vmem [#allocation4], %s147_s20  ;;  %s179_s0 = sshll.u32 %s175_s17, 4  ;;  %s180_s0 = int_to_ptr.hbm [resolvable:$true] %s179_s0 }
  0x2a   : > { %145 = vst [vmem:[%s517_s27 + $0x4] sm:$0x1] %v144_v4  ;;  %v149_v5 = vld [vmem:[%s148_s9] sm:$0x1]  ;;  %s165_s20 = scalar_lea.sflag [#allocation6], %s118_s3  ;;  %s367_s24 = sshra.s32 %s180_s0, 4  ;;  %s368_s24 = int_to_ptr.hbm [resolvable:$true] %s367_s24 }
  0x2b   : > { %150 = vst [vmem:[%s517_s27 + $0x5] sm:$0x1] %v149_v5  ;;  %s153_s8 = scalar_lea.vmem [#allocation4], %s152_s28  ;;  %s369_s25 = scalar_lea.hbm %s368_s24, 8 }
  0x2c   : > { %v154_v6 = vld [vmem:[%s153_s8] sm:$0x1]  ;;  %s158_s10 = scalar_lea.vmem [#allocation4], %s157_s30  ;;  %p370_p13 = scmp.ne.s32.totalorder %s368_s24, %s369_s25 }
  0x2d   : > { %155 = vst [vmem:[%s517_s27 + $0x6] sm:$0x1] %v154_v6  ;;  %v159_v7 = vld [vmem:[%s158_s10] sm:$0x1]  ;;  %s373_s4 = scalar_lea.hbm %s565_s2, 16  ;;  %p374_p2 = scmp.lt.s32.totalorder %s368_s24, %s565_s2 }
  0x2e   : > { %160 = vst [vmem:[%s517_s27 + $0x7] sm:$0x1] %v159_v7  ;;  %p371_p0 = pnand %p370_p13, %p483_p5  ;;  %p375_p3 = scmp.lt.s32.totalorder %s373_s4, %s369_s25 }
  0x30   : > { %p372_p1 = pneg %p371_p0  ;;  %p376_p4 = por %p375_p3, %p374_p2 }
  0x32   : > { %p377_p7 = pnand %p376_p4, %p372_p1 }
  0x35   : > { %v161_v8 = vld [vmem:[%s517_s27] sm:$0xff] }
  0x36   : > { %v162_v9 = vmul.f32 11.313708, %v161_v8 }
  0x38   : > { %163 = vst [vmem:[%s517_s27] sm:$0xff] %v162_v9 }
  0x39   : > { %380 = shalt.err (!%p377_p7)
}
  0x3a   : > { %262 = dma.vmem_to_hbm [thread:$0]  (%p483_p5), %s178_s19, 128, %s180_s0, %s165_s20  }
  0x3b PF: > { %p274_p8 = scmp.ge.s32.totalorder %s421_s16, 2  ;;  %s191_s3 = sand.u32 1, %s409_s13  }
  0x3c   : > { %s192_s27 = scalar_lea.sflag [#allocation6], %s191_s3 }
  0x3d   : > { %p269_p9 = pnand %p274_p8, %p487_p6 }
  0x3f   : > { %p270_p10 = pneg %p269_p9 }
  0x41   : > { %404 = dma.done.wait (%p270_p10), %s192_s27, 128  }
  0x42   : > { %406 = vsyncadd (%p270_p10), %s192_s27, 4294967168  ;;  %p21_p11 = scmp.ge.s32.totalorder %s470_s18, 4   ;;  %s568_s13 = smov %s413_s14 }
  0x43   : > { %s569_s14 = smov %s417_s15  ;;  %s570_s15 = smov %s481_s21 }
  0x44   : > { %s571_s16 = smov %s470_s18  ;;  %23 = sbr.rel (!%p21_p11) target bundleno = 10 (0xa), region = 69 }
  0x49   :  { %198 = vsyncpa [#allocation5], 1 }
  0x4a   :  { %200 = vsyncpa [#allocation5 + $0x1], 1 }
  0x4b   :  { %201 = vsyncpa [#allocation6], 1 }
  0x4c   :  { %203 = vsyncpa [#allocation6 + $0x1], 1 }

</bundles_post_ra>
